<compile_context>
chip_gen: v6e
topology: v6e:2x2x1
jax: 0.10.0
libtpu: 0.0.40
codegen_flags: <defaults>
</compile_context>

<pallas_src>
import functools
import math

import jax
import jax.numpy as jnp
from jax import lax
from jax.experimental import pallas as pl
from jax.experimental.pallas import tpu as pltpu


def make_positional_encoding_table(d_model: int, max_source_length: int) -> jnp.ndarray:
    """Deterministic sinusoidal table, identical to the PyTorch __init__."""
    position = jnp.arange(0, max_source_length, dtype=jnp.float32)[:, None]
    scale_factor = -math.log(10000.0) / d_model
    div_term = jnp.exp(jnp.arange(0, d_model, 2, dtype=jnp.float32) * scale_factor)
    pe = jnp.zeros((max_source_length, d_model), dtype=jnp.float32)
    pe = pe.at[:, 0::2].set(jnp.sin(position * div_term))
    pe = pe.at[:, 1::2].set(jnp.cos(position * div_term))
    return pe  # (max_source_length, d_model)


# --------------------------------------------------------------------------- #
# Kernels
# --------------------------------------------------------------------------- #
def _pe_gather_kernel(idx_ref, pe_ref, out_ref):
    """out[r, :] = pe[idx[r], :] for one (TR, TD) tile.  Pure gather + store.

    idx_ref : VMEM (TR, 1) int32   -- row index into the table slab
    pe_ref  : VMEM (L, TD) float32 -- resident (sliced) PE table block
    out_ref : VMEM (TR, TD)
    """
    table = pe_ref[...]                                  # (L, TD) f32
    idx = idx_ref[...][:, 0]                             # (TR,) int32
    # In-kernel clamp: the ragged tail of the last row tile holds unspecified
    # index values and VMEM refs are not bounds-checked.
    idx = jnp.clip(idx, 0, table.shape[0] - 1)
    out_ref[...] = jnp.take(table, idx, axis=0, mode="clip").astype(out_ref.dtype)


def _pe_onehot_kernel(idx_ref, pe_ref, out_ref):
    """Fallback: exact one-hot gather on the MXU.

    Only used if the dynamic sublane gather above does not lower on the
    installed jax/libtpu.  Its cost is bounded by the sliced table length
    (~seq_len rows), not max_source_length.
    """
    idx = idx_ref[...]                                   # (TR, 1) int32
    tr = idx.shape[0]
    l = pe_ref.shape[0]
    # Out-of-range / garbage indices produce all-zero rows (no memory access
    # by value), so this is always safe.
    onehot = (idx == lax.broadcasted_iota(jnp.int32, (tr, l), 1)).astype(jnp.float32)
    out_ref[...] = jnp.dot(
        onehot, pe_ref[...],
        preferred_element_type=jnp.float32,
        precision=lax.Precision.HIGHEST,                 # exact 0/1 selection of f32
    ).astype(out_ref.dtype)


# --------------------------------------------------------------------------- #
# pallas_call builder
# --------------------------------------------------------------------------- #
def _vmem_cap_bytes() -> int:
    try:
        return int(pltpu.get_tpu_info().vmem_capacity_bytes)
    except Exception:
        return 64 << 20  # conservative: v7x has 64 MiB per TensorCore


@functools.lru_cache(maxsize=None)
def _build_pe_call(impl: str, rows: int, d_model: int, table_rows: int,
                   tr: int, td: int, out_dtype_name: str, vmem_limit: int):
    kernel = _pe_gather_kernel if impl == "gather" else _pe_onehot_kernel
    out_dtype = jnp.dtype(out_dtype_name)
    # Column-tile axis first (slow), row-tile axis last (fast) so the resident
    # table block is unchanged across the inner loop; both axes are parallel
    # (disjoint output tiles) so v7x's two TensorCores can split the grid.
    grid = (pl.cdiv(d_model, td), pl.cdiv(rows, tr))
    return pl.pallas_call(
        kernel,
        out_shape=jax.ShapeDtypeStruct((rows, d_model), out_dtype),
        grid_spec=pltpu.PrefetchScalarGridSpec(
            num_scalar_prefetch=0,
            grid=grid,
            in_specs=[
                pl.BlockSpec((tr, 1), lambda j, i: (i, 0)),            # indices
                pl.BlockSpec((table_rows, td), lambda j, i: (0, j)),   # PE slab
            ],
            out_specs=pl.BlockSpec((tr, td), lambda j, i: (i, j)),
        ),
        compiler_params=pltpu.CompilerParams(
            dimension_semantics=("parallel", "parallel"),
            vmem_limit_bytes=vmem_limit,
        ),
    )


# --------------------------------------------------------------------------- #
# Forward wrapper (mirrors PositionalEncoding.forward)
# --------------------------------------------------------------------------- #
_DYNAMIC_GATHER_OK: bool | None = None  # set to False once gather lowering fails


def positional_encoding_forward(symbols: jnp.ndarray,
                                pe_table: jnp.ndarray,
                                pad_idx: int,
                                mask: jnp.ndarray | None = None,
                                out_dtype=None) -> jnp.ndarray:
    """Replicates PositionalEncoding.forward (mask assumed boolean / 0-1)."""
    global _DYNAMIC_GATHER_OK

    B, seq_len = symbols.shape
    max_len, d_model = pe_table.shape
    out_dtype = jnp.dtype(out_dtype) if out_dtype is not None else jnp.dtype(pe_table.dtype)

    # ---- index preparation (tiny: O(B*seq_len) int ops) ---------------------
    if mask is not None:
        indices = jnp.cumsum((mask != 0).astype(jnp.int32), axis=1)   # 1-based
    else:
        indices = jnp.broadcast_to(
            jnp.arange(seq_len, dtype=jnp.int32)[None, :], (B, seq_len))
    # Only rows [0, min(seq_len, max_len-1)] can ever be selected; clamp like
    # JAX gather semantics (torch would raise on OOB, so any choice is legal).
    l_real = min(seq_len + 1, max_len)
    indices = jnp.minimum(indices, l_real - 1).astype(jnp.int32)
    # Fold the pad mask into the index stream: pads point at an all-zero row.
    zero_row = l_real
    indices = jnp.where(symbols != pad_idx, indices, zero_row).astype(jnp.int32)

    # ---- sliced / padded table slab (bounds VMEM by seq_len, not max_len) ---
    table_rows = ((l_real + 1 + 7) // 8) * 8          # + zero row, multiple of 8
    table = jnp.zeros((table_rows, d_model), jnp.float32)
    table = table.at[:l_real].set(pe_table[:l_real].astype(jnp.float32))

    # ---- tile sizing ---------------------------------------------------------
    rows = B * seq_len
    if d_model > 2048 and d_model % 128 == 0:
        td = 512                                       # column tiles (v7x VMEM)
    else:
        td = d_model                                   # lane-dense when %128 == 0
    tr = (2 << 20) // (4 * td)                         # ~2 MiB output tile
    tr = max(256, min(tr, 4096))
    tr = (tr // 8) * 8
    if rows <= tr:
        tr = rows                                      # full extent is always legal

    needed = (2 * table_rows * td * 4                  # double-buffered table block
              + 2 * tr * td * out_dtype.itemsize       # double-buffered output tile
              + 2 * tr * 4                             # double-buffered index tile
              + (4 << 20))                             # headroom / compiler scratch
    cap = (_vmem_cap_bytes() * 3) // 4
    vmem_limit = int(max(min(needed, cap), min(32 << 20, cap)))

    idx_col = indices.reshape(rows, 1)
    build = functools.partial(
        _build_pe_call, rows=rows, d_model=d_model, table_rows=table_rows,
        tr=tr, td=td, out_dtype_name=out_dtype.name, vmem_limit=vmem_limit)

    out_flat = None
    if _DYNAMIC_GATHER_OK is not False:
        try:
            out_flat = build(impl="gather")(idx_col, table)
            if _DYNAMIC_GATHER_OK is None:
                # First call: force compile + run so any lowering problem
                # surfaces here and we can fall back cleanly.
                out_flat = jax.block_until_ready(out_flat)
            _DYNAMIC_GATHER_OK = True
        except Exception:                              # gather not lowerable here
            _DYNAMIC_GATHER_OK = False
            out_flat = None
    if out_flat is None:
        out_flat = build(impl="onehot")(idx_col, table)

    return out_flat.reshape(B, seq_len, d_model)


# --------------------------------------------------------------------------- #
# Pure-JAX reference & tests
# --------------------------------------------------------------------------- #
def _reference(symbols, pe_table, pad_idx, mask=None):
    B, S = symbols.shape
    if mask is not None:
        indices = jnp.cumsum((mask != 0).astype(jnp.int32), axis=1)
    else:
        indices = jnp.broadcast_to(jnp.arange(S, dtype=jnp.int32)[None, :], (B, S))
    out = pe_table[indices]
    pad_mask = (symbols != pad_idx)[:, :, None].astype(out.dtype)
    return out * pad_mask


def _run_case(key, B, seq_len, d_model, max_source_length, pad_idx):
    k1, k2 = jax.random.split(key)
    symbols = jax.random.randint(k1, (B, seq_len), 0, 6, dtype=jnp.int32)
    mask = jax.random.bernoulli(k2, 0.5, (B, seq_len)).astype(jnp.int32)
    pe_table = make_positional_encoding_table(d_model, max_source_length)

    for m in (None, mask):
        out = jax.block_until_ready(
            positional_encoding_forward(symbols, pe_table, pad_idx, mask=m))
        ref = _reference(symbols, pe_table, pad_idx, mask=m)
        assert out.shape == (B, seq_len, d_model)
        err = jnp.max(jnp.abs(out - ref))
        assert jnp.allclose(out, ref, atol=1e-5), f"mismatch, max abs err={err}"


if __name__ == "__main__":
    key = jax.random.PRNGKey(0)
    k_a, k_b = jax.random.split(key)
    # Small config matching the module test (d_model < 128 -> masked stores).
    _run_case(k_a, B=2, seq_len=8, d_model=32, max_source_length=16, pad_idx=0)
    # Lane-dense config (d_model multiple of 128 -> unmasked vst path).
    _run_case(k_b, B=4, seq_len=16, d_model=128, max_source_length=64, pad_idx=0)
    print("KERNEL_OK")
</pallas_src>

<mosaic_0001>
module attributes {stable_mosaic.version = 11 : i64} {
  func.func @_pe_onehot_kernel(%arg0: i32, %arg1: i32, %arg2: memref<16x1xi32, #tpu.memory_space<vmem>>, %arg3: memref<16x32xf32, #tpu.memory_space<vmem>>, %arg4: memref<16x32xf32, #tpu.memory_space<vmem>>) attributes {dimension_semantics = [#tpu.dimension_semantics<parallel>, #tpu.dimension_semantics<parallel>], iteration_bounds = array<i64: 1, 1>, scalar_prefetch = 0 : i64, scratch_operands = 0 : i64, tpu.core_type = #tpu.core_type<tc>, window_params = [{transform_indices = @transform_0, window_bounds = array<i64: 16, 1>}, {transform_indices = @transform_1, window_bounds = array<i64: 16, 32>}, {transform_indices = @transform_2, window_bounds = array<i64: 16, 32>}]} {
    %c0 = arith.constant 0 : index
    %c0_0 = arith.constant 0 : index
    %0 = vector.load %arg2[%c0, %c0_0] : memref<16x1xi32, #tpu.memory_space<vmem>>, vector<16x1xi32>
    %1 = tpu.iota {dimensions = array<i32: 1>} : vector<16x16xi32>
    %2 = vector.broadcast %0 : vector<16x1xi32> to vector<16x16xi32>
    %3 = arith.cmpi eq, %2, %1 : vector<16x16xi32>
    %4 = arith.extui %3 : vector<16x16xi1> to vector<16x16xi32>
    %5 = arith.sitofp %4 : vector<16x16xi32> to vector<16x16xf32>
    %c0_1 = arith.constant 0 : index
    %c0_2 = arith.constant 0 : index
    %6 = vector.load %arg3[%c0_1, %c0_2] : memref<16x32xf32, #tpu.memory_space<vmem>>, vector<16x32xf32>
    %cst = arith.constant dense<0.000000e+00> : vector<16x32xf32>
    %7 = tpu.matmul %5, %6, %cst {dimension_numbers = #tpu.dot_dimension_numbers<[1], [0], [0], [1], [0, 0, 1, 1], [], []>, precision = #tpu.contract_precision<fp32>} : vector<16x16xf32>, vector<16x32xf32>, vector<16x32xf32> -> vector<16x32xf32>
    %c0_3 = arith.constant 0 : index
    %c0_4 = arith.constant 0 : index
    %8 = vector.load %arg4[%c0_3, %c0_4] : memref<16x32xf32, #tpu.memory_space<vmem>>, vector<16x32xf32>
    tpu.vector_store %arg4[%c0_3, %c0_4], %7 {strides = array<i32>} : memref<16x32xf32, #tpu.memory_space<vmem>>, vector<16x32xf32>,
    return
  }
  func.func @transform_0(%arg0: i32, %arg1: i32) -> (i32, i32) {
    %c0_i32 = arith.constant 0 : i32
    %c0_i32_0 = arith.constant 0 : i32
    return %arg1, %c0_i32 : i32, i32
  }
  func.func @transform_1(%arg0: i32, %arg1: i32) -> (i32, i32) {
    %c0_i32 = arith.constant 0 : i32
    %c0_i32_0 = arith.constant 0 : i32
    return %c0_i32, %arg0 : i32, i32
  }
  func.func @transform_2(%arg0: i32, %arg1: i32) -> (i32, i32) {
    %c0_i32 = arith.constant 0 : i32
    return %arg1, %arg0 : i32, i32
  }
}

</mosaic_0001>

<bundles_post_ra>
// kernel: tpu_custom_call.1
= control target key start
LH: loop header
LB: loop body
LE: loop exit
PB: predicated region body
PF: predicated region fallthrough
CT: control target
= control target key end

     0   :  { %v660_v2 = vmov 0   ;;  %s703_s0 = inlined_call_operand.vmem [shape: s32[16,1], index: 0, kind: input, shape index: {}]   ;;  %s704_s1 = inlined_call_operand.vmem [shape: f32[16,32], index: 1, kind: input, shape index: {}]   ;;  %s705_s2 = inlined_call_operand.hbm [shape: f32[16,32], index: 2, kind: output, shape index: {}]  }
   0x1   :  { %v12_v0 = vld [vmem:[%s703_s0] sm:$0xff]  ;;  %v29_v1 = vld [vmem:[%s704_s1 + $0x8] sm:$0xff]  ;;  %637 = vset.pattern.permute.xlu0 %v660_v2 }
   0x2   :  { %v66_v3 = vand.u32 4294901760, %v29_v1  ;;  %v28_v4 = vld [vmem:[%s704_s1] sm:$0xff] }
   0x3   :  { %7 = vsyncpa [#allocation3], 0  ;;  %17 = vperm.xlu0 %637, %v12_v0   ;;  %v69_v5 = vand.u32 4294901760, %v28_v4  ;;  %v13_v6 = vld [vmem:[%s703_s0 + $0x8] sm:$0xff]  ;;  %v14_v15 = vlaneseq  ;;  %vm30_vm0 = vcmask 130048   ;;  %v661_v18 = vmov 0.0  }
   0x4   :  { %v154_v7 = vsub.f32 %v29_v1, %v66_v3  ;;  %590 = vmatprep.subr.mxu0 %v66_v3  ;;  %s662_s0 = smov [#allocation2]   ;;  %vm539_vm3 = vcmask 261120  }
   0x5   :  { %v161_v8 = vsub.f32 %v28_v4, %v69_v5  ;;  %591 = vmatpush3.msra.mxu0 %v66_v3  ;;  %v15_v16 = vand.u32 127, %v14_v15  ;;  %s547_s1 = sshll.u32 %s662_s0, 4  ;;  %s548_s1 = int_to_ptr.vmem [resolvable:$true] %s547_s1 }
   0x6   :  { %v155_v9 = vand.u32 4294901760, %v154_v7  ;;  %592 = vmatprep.subr.mxu0 %v69_v5  ;;  %s638_s17 = scalar_lea.vmem %s548_s1, 256  ;;  %p643_p1 = scmp.lt.s32.totalorder %s548_s1, %s548_s1 }
   0x7   :  { %20 = vperm.xlu0 %637, %v13_v6   ;;  %v162_v10 = vand.u32 4294901760, %v161_v8  ;;  %593 = vmatpush3.msra.mxu0 %v69_v5  ;;  %p639_p0 = scmp.ne.s32.totalorder %s548_s1, %s638_s17  ;;  %p644_p2 = scmp.lt.s32.totalorder %s638_s17, %s638_s17 }
   0x8   :  { %v156_v11 = vsub.f32 %v154_v7, %v155_v9  ;;  %604 = vmatprep.subr.mxu0 %v154_v7 }
   0x9   :  { %v163_v12 = vsub.f32 %v161_v8, %v162_v10  ;;  %p645_p3 = por %p644_p2, %p643_p1 }
   0xa   :  { %v157_v13 = vand.u32 4294901760, %v156_v11 }
   0xb   :  { %v164_v14 = vand.u32 4294901760, %v163_v12  ;;  %p646_p4 = pnand %p645_p3, %p639_p0 }
   0xc   :  { %597 = vmatprep.subr.mxu1 %v157_v13 }
   0xd   :  { %598 = vmatpush3.msra.mxu1 %v157_v13 }
   0xe   :  { %599 = vmatprep.subr.mxu1 %v164_v14 }
   0xf   :  { %600 = vmatpush3.msra.mxu1 %v164_v14 }
  0x10   :  { %611 = vmatprep.subr.mxu1 %v66_v3 }
  0x7e   :  { %v18_v17 = vpop.permute.xlu0 %17 }
  0x7f   :  { %vm22_vm1 = vcmp.eq.s32.totalorder %v18_v17, %v15_v16 }
  0x80   :  { %v558_v19 = vsel %vm22_vm1, 1.0, %v661_v18 }
  0x81   :  { %v32_v20 = vsel %vm30_vm0, %v558_v19, 0  ;;  %601 = vmatprep.mubr.msk.f32.mxu1 %vm30_vm0, %v558_v19 }
  0x82   :  { %v105_v21 = vsub.f32 %v32_v20, %v32_v20  ;;  %v21_v22 = vpop.permute.xlu0 %20 }
  0x83   :  { %vm23_vm2 = vcmp.eq.s32.totalorder %v21_v22, %v15_v16 }
  0x84   :  { %v559_v23 = vsel %vm23_vm2, 1.0, %v661_v18  ;;  %v106_v24 = vand.u32 4294901760, %v105_v21 }
  0x85   :  { %v35_v25 = vsel %vm30_vm0, %v559_v23, 0  ;;  %602 = vmatmul.mubr.msk.f32.vlgmr.msra.gmra.mxu1 %vm30_vm0, %v559_v23 }
  0x86   :  { %v115_v26 = vsub.f32 %v35_v25, %v35_v25  ;;  %615 = vmatprep.mubr.f32.mxu1 %v106_v24  ;;  %612 = vmatpush3.msra.mxu1 %v66_v3  ;;  %v107_v27 = vsub.f32 %v105_v21, %v106_v24 }
  0x87   :  { %613 = vmatprep.subr.mxu1 %v69_v5 }
  0x88   :  { %614 = vmatpush3.msra.mxu1 %v69_v5  ;;  %v108_v28 = vand.u32 4294901760, %v107_v27  ;;  %v116_v29 = vand.u32 4294901760, %v115_v26 }
  0x89   :  { %625 = vmatprep.subr.mxu1 %v66_v3 }
  0x8a   :  { %594 = vmatprep.mubr.f32.mxu0 %v108_v28  ;;  %616 = vmatmul.mubr.f32.vlgmr.msra.gmra.mxu1 %v116_v29  ;;  %v117_v30 = vsub.f32 %v115_v26, %v116_v29 }
  0x8b   :  { %626 = vmatpush3.msra.mxu1 %v66_v3  ;;  %629 = vmatprep.mubr.msk.f32.mxu1 %vm30_vm0, %v558_v19 }
  0x8c   :  { %627 = vmatprep.subr.mxu1 %v69_v5  ;;  %v118_v31 = vand.u32 4294901760, %v117_v30 }
  0x8d   :  { %628 = vmatpush3.msra.mxu1 %v69_v5 }
  0x8e   :  { %595 = vmatmul.mubr.f32.vlgmr.msra.gmra.mxu0 %v118_v31  ;;  %630 = vmatmul.mubr.msk.f32.vlgmr.msra.gmra.mxu1 %vm30_vm0, %v559_v23 }
  0x8f   :  { %605 = vmatpush3.msra.mxu0 %v154_v7  ;;  %608 = vmatprep.mubr.f32.mxu0 %v105_v21 }
  0x90   :  { %606 = vmatprep.subr.mxu0 %v161_v8 }
  0x91   :  { %607 = vmatpush3.msra.mxu0 %v161_v8 }
  0x92   :  { %618 = vmatprep.subr.mxu0 %v155_v9  ;;  %609 = vmatmul.mubr.f32.vlgmr.msra.gmra.mxu0 %v115_v26 }
  0x93   :  { %619 = vmatpush3.msra.mxu0 %v155_v9  ;;  %622 = vmatprep.mubr.msk.f32.mxu0 %vm30_vm0, %v558_v19 }
  0x94   :  { %620 = vmatprep.subr.mxu0 %v162_v10 }
  0x95   :  { %621 = vmatpush3.msra.mxu0 %v162_v10 }
  0x96   :  { %623 = vmatmul.mubr.msk.f32.vlgmr.msra.gmra.mxu0 %vm30_vm0, %v559_v23 }
 0x145   :  { %v603_v32 = vpop.f32.mrf.mxu1 }
 0x147   :  { %v201_v33 = vpop.f32.mrf.mxu1 }
 0x14a   :  { %v617_v34 = vpop.f32.mrf.mxu1 }
 0x14c   :  { %v365_v38 = vpop.f32.mrf.mxu1 }
 0x14e   :  { %v596_v35 = vpop.f32.mrf.mxu0  ;;  %v631_v45 = vpop.f32.mrf.mxu1 }
 0x14f   :  { %v208_v37 = vadd.f32 %v603_v32, %v596_v35 }
 0x150   :  { %v110_v36 = vpop.f32.mrf.mxu0  ;;  %v529_v52 = vpop.f32.mrf.mxu1 }
 0x151   :  { %v202_v40 = vadd.f32 %v201_v33, %v110_v36 }
 0x152   :  { %v610_v39 = vpop.f32.mrf.mxu0 }
 0x153   :  { %v291_v41 = vadd.f32 %v610_v39, %v208_v37 }
 0x154   :  { %v283_v42 = vpop.f32.mrf.mxu0 }
 0x155   :  { %v284_v43 = vadd.f32 %v283_v42, %v202_v40  ;;  %v374_v44 = vadd.f32 %v617_v34, %v291_v41 }
 0x156   :  { %v624_v46 = vpop.f32.mrf.mxu0 }
 0x157   :  { %v457_v47 = vadd.f32 %v624_v46, %v374_v44  ;;  %v366_v48 = vadd.f32 %v365_v38, %v284_v43 }
 0x158   :  { %v450_v49 = vpop.f32.mrf.mxu0 }
 0x159   :  { %v536_v50 = vadd.f32 %v631_v45, %v457_v47  ;;  %v451_v51 = vadd.f32 %v450_v49, %v366_v48 }
 0x15b   :  { %541 = vst.msk [vmem:[#allocation2 + $0x8] sm:$0xff] %vm539_vm3, %v536_v50  ;;  %v530_v53 = vadd.f32 %v529_v52, %v451_v51 }
 0x15d   :  { %540 = vst.msk [vmem:[#allocation2] sm:$0xff] %vm539_vm3, %v530_v53 }
 0x15e   :  { %649 = shalt.err (!%p646_p4)
}
 0x15f   :  { %s663_s18 = smov 128   ;;  %s664_s19 = smov 8  }
 0x160   :  { %553 = dma.vmem_to_hbm [thread:$0]  %s548_s1, 256, %s705_s2, [#allocation3], %s663_s18, %s663_s18, %s664_s19  }
 0x161   :  { %658 = dma.done.wait [#allocation3], 256  }
 0x162   :  { %659 = vsyncadd [#allocation3], 4294967040 }
 0x163   :  { %557 = vsyncpa [#allocation3], 1 }

</bundles_post_ra>
